<compile_context>
chip_gen: v6e
topology: v6e:2x2x1
jax: 0.10.0
libtpu: 0.0.40
codegen_flags: <defaults>
</compile_context>

<pallas_src>
from functools import partial

import numpy as np
import jax
import jax.numpy as jnp
from jax import lax
from jax.experimental import pallas as pl
from jax.experimental.pallas import tpu as pltpu


def _uniform_knots(num_knots):
    return tuple(float(v) for v in np.linspace(-1.0, 1.0, num_knots))


def _bspline_bases(xc, knots, degree):
    """Uniform-knot Cox-de Boor B-spline bases, elementwise over any array.

    `knots` is a static tuple of strictly increasing python floats.  Returns a
    list of (len(knots) - degree - 1) arrays shaped like `xc` (float32).
    The degree-0 layer uses a single floor() bucketization instead of
    per-interval double compares; all denominators are folded to constant
    reciprocals (no vector divides).
    """
    nk = len(knots)
    k0, k_last = knots[0], knots[-1]
    inv_h = float(nk - 1) / (k_last - k0)

    # degree 0: cell index (right endpoint folded into the last interval)
    cell = jnp.clip(jnp.floor((xc - k0) * inv_h), 0.0, float(nk - 2))
    N = [(cell == float(i)).astype(jnp.float32) for i in range(nk - 1)]

    # higher degrees
    for p in range(1, degree + 1):
        Nn = []
        for i in range(nk - 1 - p):
            d1 = knots[i + p] - knots[i]
            d2 = knots[i + p + 1] - knots[i + 1]
            terms = []
            if d1 > 0.0:
                terms.append(((xc - knots[i]) * (1.0 / d1)) * N[i])
            if d2 > 0.0:
                terms.append(((knots[i + p + 1] - xc) * (1.0 / d2)) * N[i + 1])
            Nn.append(terms[0] + terms[1] if len(terms) == 2 else terms[0])
        N = Nn
    return N


def _efficient_kan_kernel(xT_ref, proj_ref, out_ref, stack_ref, *, knots, degree):
    xT = xT_ref[...]                              # (D, TB) f32, batch on lanes
    D = xT.shape[0]

    # Lane-dense B-spline basis expansion (elementwise over the (D, TB) tile).
    xc = jnp.clip(xT, knots[0], knots[-1])
    N = _bspline_bases(xc, knots, degree)         # K arrays, each (D, TB)
    K = len(N)
    for k, Nk in enumerate(N):                    # sublane-aligned static slices
        stack_ref[k * D:(k + 1) * D, :] = Nk
    stack_ref[K * D:(K + 1) * D, :] = xT * xT     # squared features (interaction)

    # One MXU matmul (A^T B): the 0/1 permutation block of `proj` scatters the
    # basis values into the torch feature-major column order; the sigmoid(W)
    # block computes the interaction features.  Single lane-dense store.
    out_ref[...] = lax.dot_general(
        stack_ref[...], proj_ref[...],
        dimension_numbers=(((0,), (0,)), ((), ())),
        preferred_element_type=jnp.float32)


def efficient_kan_forward(x, interaction_weights, *, num_knots=10, degree=3,
                          block_batch=256):
    """Pallas implementation of EfficientKAN.forward (basis_type='bsplines')."""
    B, D = x.shape
    K = num_knots - degree - 1
    assert K >= 1, "num_knots must exceed degree + 1"
    OUT = D * K + D
    knots = _uniform_knots(num_knots)

    # --- one-time (per call) wrapper-side prep (tiny, handled by XLA) -------
    # sigmoid(W) hoisted out of the per-tile kernel body; permutation block is
    # a compile-time numpy constant.
    perm = np.zeros((K * D, OUT), dtype=np.float32)
    for k in range(K):
        for i in range(D):
            perm[k * D + i, i * K + k] = 1.0
    sw = jax.nn.sigmoid(interaction_weights.astype(jnp.float32))        # (D, D)
    sw_block = jnp.concatenate(
        [jnp.zeros((D, D * K), jnp.float32), sw], axis=1)               # (D, OUT)
    proj = jnp.concatenate([jnp.asarray(perm), sw_block], axis=0)       # ((K+1)*D, OUT)

    xT = jnp.transpose(x).astype(jnp.float32)                           # (D, B)

    # --- batch tile = lane dimension inside the kernel ----------------------
    if B <= block_batch:
        tb = B                                   # block == full dim: always legal
    else:
        tb = max(128, (block_batch // 128) * 128)  # multiple of 128 lanes

    kernel = partial(_efficient_kan_kernel, knots=knots, degree=degree)
    out = pl.pallas_call(
        kernel,
        out_shape=jax.ShapeDtypeStruct((B, OUT), jnp.float32),
        grid=(pl.cdiv(B, tb),),
        in_specs=[
            pl.BlockSpec((D, tb), lambda i: (0, i)),              # x^T batch tile
            pl.BlockSpec(((K + 1) * D, OUT), lambda i: (0, 0)),   # proj (whole)
        ],
        out_specs=pl.BlockSpec((tb, OUT), lambda i: (i, 0)),
        scratch_shapes=[pltpu.VMEM(((K + 1) * D, tb), jnp.float32)],
        compiler_params=pltpu.CompilerParams(
            dimension_semantics=("parallel",),
            vmem_limit_bytes=32 * 1024 * 1024,
        ),
    )(xT, proj)
    return out


def efficient_kan_reference(x, interaction_weights, *, num_knots=10, degree=3):
    """Pure-JAX reference with identical semantics."""
    B, D = x.shape
    knots = _uniform_knots(num_knots)
    xc = jnp.clip(x, knots[0], knots[-1])
    N = _bspline_bases(xc, knots, degree)                     # list of (B, D)
    basis = jnp.stack(N, axis=-1).reshape(B, -1)              # (B, D*K) feature-major
    inter = jnp.dot(x * x, jax.nn.sigmoid(interaction_weights),
                    precision=lax.Precision.HIGHEST)          # (B, D)
    return jnp.concatenate([basis, inter], axis=1)


if __name__ == "__main__":
    NUM_KNOTS, DEGREE = 10, 3
    B, D = 256, 8                     # batch=256, input_dim=8 (small demo)
    K = NUM_KNOTS - DEGREE - 1        # 6 basis functions per feature

    key = jax.random.PRNGKey(0)
    kx, kw = jax.random.split(key)
    x = jax.random.uniform(kx, (B, D), dtype=jnp.float32, minval=-1.0, maxval=1.0)
    # interaction_weights = nn.Parameter(torch.randn(D, D)) -> deterministic normal
    interaction_weights = jax.random.normal(kw, (D, D), dtype=jnp.float32)

    out = efficient_kan_forward(x, interaction_weights,
                                num_knots=NUM_KNOTS, degree=DEGREE,
                                block_batch=128)   # 2 grid steps -> pipelined
    out = jax.block_until_ready(out)

    assert out.shape == (B, D * K + D), out.shape
    ref = efficient_kan_reference(x, interaction_weights,
                                  num_knots=NUM_KNOTS, degree=DEGREE)
    np.testing.assert_allclose(np.asarray(out), np.asarray(ref),
                               rtol=1e-4, atol=1e-4)
    print("KERNEL_OK")
</pallas_src>

<mosaic_0001>
module attributes {stable_mosaic.version = 11 : i64} {
  func.func @_efficient_kan_kernel(%arg0: i32, %arg1: memref<8x128xf32, #tpu.memory_space<vmem>>, %arg2: memref<56x56xf32, #tpu.memory_space<vmem>>, %arg3: memref<128x56xf32, #tpu.memory_space<vmem>>, %arg4: memref<56x128xf32, #tpu.memory_space<vmem>>) attributes {dimension_semantics = [#tpu.dimension_semantics<parallel>], iteration_bounds = array<i64: 2>, scalar_prefetch = 0 : i64, scratch_operands = 1 : i64, tpu.core_type = #tpu.core_type<tc>, window_params = [{transform_indices = @transform_0, window_bounds = array<i64: 8, 128>}, {pipeline_mode = #tpu.pipeline_mode<synchronous>, transform_indices = @transform_1, window_bounds = array<i64: 56, 56>}, {transform_indices = @transform_2, window_bounds = array<i64: 128, 56>}]} {
    %c0 = arith.constant 0 : index
    %c0_0 = arith.constant 0 : index
    %0 = vector.load %arg1[%c0, %c0_0] : memref<8x128xf32, #tpu.memory_space<vmem>>, vector<8x128xf32>
    %cst = arith.constant -1.000000e+00 : f32
    %cst_1 = arith.constant 1.000000e+00 : f32
    %1 = vector.broadcast %cst : f32 to vector<8x128xf32>
    %2 = arith.maximumf %1, %0 : vector<8x128xf32>
    %3 = vector.broadcast %cst_1 : f32 to vector<8x128xf32>
    %4 = arith.minimumf %3, %2 : vector<8x128xf32>
    %cst_2 = arith.constant -1.000000e+00 : f32
    %5 = vector.broadcast %cst_2 : f32 to vector<8x128xf32>
    %6 = arith.subf %4, %5 : vector<8x128xf32>
    %cst_3 = arith.constant 4.500000e+00 : f32
    %7 = vector.broadcast %cst_3 : f32 to vector<8x128xf32>
    %8 = arith.mulf %6, %7 : vector<8x128xf32>
    %9 = math.floor %8 : vector<8x128xf32>
    %cst_4 = arith.constant 0.000000e+00 : f32
    %cst_5 = arith.constant 8.000000e+00 : f32
    %10 = vector.broadcast %cst_4 : f32 to vector<8x128xf32>
    %11 = arith.maximumf %10, %9 : vector<8x128xf32>
    %12 = vector.broadcast %cst_5 : f32 to vector<8x128xf32>
    %13 = arith.minimumf %12, %11 : vector<8x128xf32>
    %cst_6 = arith.constant 0.000000e+00 : f32
    %14 = vector.broadcast %cst_6 : f32 to vector<8x128xf32>
    %15 = arith.cmpf oeq, %13, %14 : vector<8x128xf32>
    %16 = arith.extui %15 : vector<8x128xi1> to vector<8x128xi32>
    %17 = arith.sitofp %16 : vector<8x128xi32> to vector<8x128xf32>
    %cst_7 = arith.constant 1.000000e+00 : f32
    %18 = vector.broadcast %cst_7 : f32 to vector<8x128xf32>
    %19 = arith.cmpf oeq, %13, %18 : vector<8x128xf32>
    %20 = arith.extui %19 : vector<8x128xi1> to vector<8x128xi32>
    %21 = arith.sitofp %20 : vector<8x128xi32> to vector<8x128xf32>
    %cst_8 = arith.constant 2.000000e+00 : f32
    %22 = vector.broadcast %cst_8 : f32 to vector<8x128xf32>
    %23 = arith.cmpf oeq, %13, %22 : vector<8x128xf32>
    %24 = arith.extui %23 : vector<8x128xi1> to vector<8x128xi32>
    %25 = arith.sitofp %24 : vector<8x128xi32> to vector<8x128xf32>
    %cst_9 = arith.constant 3.000000e+00 : f32
    %26 = vector.broadcast %cst_9 : f32 to vector<8x128xf32>
    %27 = arith.cmpf oeq, %13, %26 : vector<8x128xf32>
    %28 = arith.extui %27 : vector<8x128xi1> to vector<8x128xi32>
    %29 = arith.sitofp %28 : vector<8x128xi32> to vector<8x128xf32>
    %cst_10 = arith.constant 4.000000e+00 : f32
    %30 = vector.broadcast %cst_10 : f32 to vector<8x128xf32>
    %31 = arith.cmpf oeq, %13, %30 : vector<8x128xf32>
    %32 = arith.extui %31 : vector<8x128xi1> to vector<8x128xi32>
    %33 = arith.sitofp %32 : vector<8x128xi32> to vector<8x128xf32>
    %cst_11 = arith.constant 5.000000e+00 : f32
    %34 = vector.broadcast %cst_11 : f32 to vector<8x128xf32>
    %35 = arith.cmpf oeq, %13, %34 : vector<8x128xf32>
    %36 = arith.extui %35 : vector<8x128xi1> to vector<8x128xi32>
    %37 = arith.sitofp %36 : vector<8x128xi32> to vector<8x128xf32>
    %cst_12 = arith.constant 6.000000e+00 : f32
    %38 = vector.broadcast %cst_12 : f32 to vector<8x128xf32>
    %39 = arith.cmpf oeq, %13, %38 : vector<8x128xf32>
    %40 = arith.extui %39 : vector<8x128xi1> to vector<8x128xi32>
    %41 = arith.sitofp %40 : vector<8x128xi32> to vector<8x128xf32>
    %cst_13 = arith.constant 7.000000e+00 : f32
    %42 = vector.broadcast %cst_13 : f32 to vector<8x128xf32>
    %43 = arith.cmpf oeq, %13, %42 : vector<8x128xf32>
    %44 = arith.extui %43 : vector<8x128xi1> to vector<8x128xi32>
    %45 = arith.sitofp %44 : vector<8x128xi32> to vector<8x128xf32>
    %cst_14 = arith.constant 8.000000e+00 : f32
    %46 = vector.broadcast %cst_14 : f32 to vector<8x128xf32>
    %47 = arith.cmpf oeq, %13, %46 : vector<8x128xf32>
    %48 = arith.extui %47 : vector<8x128xi1> to vector<8x128xi32>
    %49 = arith.sitofp %48 : vector<8x128xi32> to vector<8x128xf32>
    %cst_15 = arith.constant -1.000000e+00 : f32
    %50 = vector.broadcast %cst_15 : f32 to vector<8x128xf32>
    %51 = arith.subf %4, %50 : vector<8x128xf32>
    %cst_16 = arith.constant 4.500000e+00 : f32
    %52 = vector.broadcast %cst_16 : f32 to vector<8x128xf32>
    %53 = arith.mulf %51, %52 : vector<8x128xf32>
    %54 = arith.mulf %53, %17 : vector<8x128xf32>
    %cst_17 = arith.constant -0.555555582 : f32
    %55 = vector.broadcast %cst_17 : f32 to vector<8x128xf32>
    %56 = arith.subf %55, %4 : vector<8x128xf32>
    %cst_18 = arith.constant 4.500000e+00 : f32
    %57 = vector.broadcast %cst_18 : f32 to vector<8x128xf32>
    %58 = arith.mulf %56, %57 : vector<8x128xf32>
    %59 = arith.mulf %58, %21 : vector<8x128xf32>
    %60 = arith.addf %54, %59 : vector<8x128xf32>
    %cst_19 = arith.constant -0.777777791 : f32
    %61 = vector.broadcast %cst_19 : f32 to vector<8x128xf32>
    %62 = arith.subf %4, %61 : vector<8x128xf32>
    %cst_20 = arith.constant 4.500000e+00 : f32
    %63 = vector.broadcast %cst_20 : f32 to vector<8x128xf32>
    %64 = arith.mulf %62, %63 : vector<8x128xf32>
    %65 = arith.mulf %64, %21 : vector<8x128xf32>
    %cst_21 = arith.constant -0.333333343 : f32
    %66 = vector.broadcast %cst_21 : f32 to vector<8x128xf32>
    %67 = arith.subf %66, %4 : vector<8x128xf32>
    %cst_22 = arith.constant 4.500000e+00 : f32
    %68 = vector.broadcast %cst_22 : f32 to vector<8x128xf32>
    %69 = arith.mulf %67, %68 : vector<8x128xf32>
    %70 = arith.mulf %69, %25 : vector<8x128xf32>
    %71 = arith.addf %65, %70 : vector<8x128xf32>
    %cst_23 = arith.constant -0.555555582 : f32
    %72 = vector.broadcast %cst_23 : f32 to vector<8x128xf32>
    %73 = arith.subf %4, %72 : vector<8x128xf32>
    %cst_24 = arith.constant 4.500000e+00 : f32
    %74 = vector.broadcast %cst_24 : f32 to vector<8x128xf32>
    %75 = arith.mulf %73, %74 : vector<8x128xf32>
    %76 = arith.mulf %75, %25 : vector<8x128xf32>
    %cst_25 = arith.constant -0.111111112 : f32
    %77 = vector.broadcast %cst_25 : f32 to vector<8x128xf32>
    %78 = arith.subf %77, %4 : vector<8x128xf32>
    %cst_26 = arith.constant 4.500000e+00 : f32
    %79 = vector.broadcast %cst_26 : f32 to vector<8x128xf32>
    %80 = arith.mulf %78, %79 : vector<8x128xf32>
    %81 = arith.mulf %80, %29 : vector<8x128xf32>
    %82 = arith.addf %76, %81 : vector<8x128xf32>
    %cst_27 = arith.constant -0.333333343 : f32
    %83 = vector.broadcast %cst_27 : f32 to vector<8x128xf32>
    %84 = arith.subf %4, %83 : vector<8x128xf32>
    %cst_28 = arith.constant 4.500000e+00 : f32
    %85 = vector.broadcast %cst_28 : f32 to vector<8x128xf32>
    %86 = arith.mulf %84, %85 : vector<8x128xf32>
    %87 = arith.mulf %86, %29 : vector<8x128xf32>
    %cst_29 = arith.constant 0.111111112 : f32
    %88 = vector.broadcast %cst_29 : f32 to vector<8x128xf32>
    %89 = arith.subf %88, %4 : vector<8x128xf32>
    %cst_30 = arith.constant 4.500000e+00 : f32
    %90 = vector.broadcast %cst_30 : f32 to vector<8x128xf32>
    %91 = arith.mulf %89, %90 : vector<8x128xf32>
    %92 = arith.mulf %91, %33 : vector<8x128xf32>
    %93 = arith.addf %87, %92 : vector<8x128xf32>
    %cst_31 = arith.constant -0.111111112 : f32
    %94 = vector.broadcast %cst_31 : f32 to vector<8x128xf32>
    %95 = arith.subf %4, %94 : vector<8x128xf32>
    %cst_32 = arith.constant 4.500000e+00 : f32
    %96 = vector.broadcast %cst_32 : f32 to vector<8x128xf32>
    %97 = arith.mulf %95, %96 : vector<8x128xf32>
    %98 = arith.mulf %97, %33 : vector<8x128xf32>
    %cst_33 = arith.constant 0.333333343 : f32
    %99 = vector.broadcast %cst_33 : f32 to vector<8x128xf32>
    %100 = arith.subf %99, %4 : vector<8x128xf32>
    %cst_34 = arith.constant 4.500000e+00 : f32
    %101 = vector.broadcast %cst_34 : f32 to vector<8x128xf32>
    %102 = arith.mulf %100, %101 : vector<8x128xf32>
    %103 = arith.mulf %102, %37 : vector<8x128xf32>
    %104 = arith.addf %98, %103 : vector<8x128xf32>
    %cst_35 = arith.constant 0.111111112 : f32
    %105 = vector.broadcast %cst_35 : f32 to vector<8x128xf32>
    %106 = arith.subf %4, %105 : vector<8x128xf32>
    %cst_36 = arith.constant 4.500000e+00 : f32
    %107 = vector.broadcast %cst_36 : f32 to vector<8x128xf32>
    %108 = arith.mulf %106, %107 : vector<8x128xf32>
    %109 = arith.mulf %108, %37 : vector<8x128xf32>
    %cst_37 = arith.constant 0.555555582 : f32
    %110 = vector.broadcast %cst_37 : f32 to vector<8x128xf32>
    %111 = arith.subf %110, %4 : vector<8x128xf32>
    %cst_38 = arith.constant 4.500000e+00 : f32
    %112 = vector.broadcast %cst_38 : f32 to vector<8x128xf32>
    %113 = arith.mulf %111, %112 : vector<8x128xf32>
    %114 = arith.mulf %113, %41 : vector<8x128xf32>
    %115 = arith.addf %109, %114 : vector<8x128xf32>
    %cst_39 = arith.constant 0.333333343 : f32
    %116 = vector.broadcast %cst_39 : f32 to vector<8x128xf32>
    %117 = arith.subf %4, %116 : vector<8x128xf32>
    %cst_40 = arith.constant 4.500000e+00 : f32
    %118 = vector.broadcast %cst_40 : f32 to vector<8x128xf32>
    %119 = arith.mulf %117, %118 : vector<8x128xf32>
    %120 = arith.mulf %119, %41 : vector<8x128xf32>
    %cst_41 = arith.constant 0.777777791 : f32
    %121 = vector.broadcast %cst_41 : f32 to vector<8x128xf32>
    %122 = arith.subf %121, %4 : vector<8x128xf32>
    %cst_42 = arith.constant 4.500000e+00 : f32
    %123 = vector.broadcast %cst_42 : f32 to vector<8x128xf32>
    %124 = arith.mulf %122, %123 : vector<8x128xf32>
    %125 = arith.mulf %124, %45 : vector<8x128xf32>
    %126 = arith.addf %120, %125 : vector<8x128xf32>
    %cst_43 = arith.constant 0.555555582 : f32
    %127 = vector.broadcast %cst_43 : f32 to vector<8x128xf32>
    %128 = arith.subf %4, %127 : vector<8x128xf32>
    %cst_44 = arith.constant 4.500000e+00 : f32
    %129 = vector.broadcast %cst_44 : f32 to vector<8x128xf32>
    %130 = arith.mulf %128, %129 : vector<8x128xf32>
    %131 = arith.mulf %130, %45 : vector<8x128xf32>
    %cst_45 = arith.constant 1.000000e+00 : f32
    %132 = vector.broadcast %cst_45 : f32 to vector<8x128xf32>
    %133 = arith.subf %132, %4 : vector<8x128xf32>
    %cst_46 = arith.constant 4.500000e+00 : f32
    %134 = vector.broadcast %cst_46 : f32 to vector<8x128xf32>
    %135 = arith.mulf %133, %134 : vector<8x128xf32>
    %136 = arith.mulf %135, %49 : vector<8x128xf32>
    %137 = arith.addf %131, %136 : vector<8x128xf32>
    %cst_47 = arith.constant -1.000000e+00 : f32
    %138 = vector.broadcast %cst_47 : f32 to vector<8x128xf32>
    %139 = arith.subf %4, %138 : vector<8x128xf32>
    %cst_48 = arith.constant 2.250000e+00 : f32
    %140 = vector.broadcast %cst_48 : f32 to vector<8x128xf32>
    %141 = arith.mulf %139, %140 : vector<8x128xf32>
    %142 = arith.mulf %141, %60 : vector<8x128xf32>
    %cst_49 = arith.constant -0.333333343 : f32
    %143 = vector.broadcast %cst_49 : f32 to vector<8x128xf32>
    %144 = arith.subf %143, %4 : vector<8x128xf32>
    %cst_50 = arith.constant 2.250000e+00 : f32
    %145 = vector.broadcast %cst_50 : f32 to vector<8x128xf32>
    %146 = arith.mulf %144, %145 : vector<8x128xf32>
    %147 = arith.mulf %146, %71 : vector<8x128xf32>
    %148 = arith.addf %142, %147 : vector<8x128xf32>
    %cst_51 = arith.constant -0.777777791 : f32
    %149 = vector.broadcast %cst_51 : f32 to vector<8x128xf32>
    %150 = arith.subf %4, %149 : vector<8x128xf32>
    %cst_52 = arith.constant 2.250000e+00 : f32
    %151 = vector.broadcast %cst_52 : f32 to vector<8x128xf32>
    %152 = arith.mulf %150, %151 : vector<8x128xf32>
    %153 = arith.mulf %152, %71 : vector<8x128xf32>
    %cst_53 = arith.constant -0.111111112 : f32
    %154 = vector.broadcast %cst_53 : f32 to vector<8x128xf32>
    %155 = arith.subf %154, %4 : vector<8x128xf32>
    %cst_54 = arith.constant 2.250000e+00 : f32
    %156 = vector.broadcast %cst_54 : f32 to vector<8x128xf32>
    %157 = arith.mulf %155, %156 : vector<8x128xf32>
    %158 = arith.mulf %157, %82 : vector<8x128xf32>
    %159 = arith.addf %153, %158 : vector<8x128xf32>
    %cst_55 = arith.constant -0.555555582 : f32
    %160 = vector.broadcast %cst_55 : f32 to vector<8x128xf32>
    %161 = arith.subf %4, %160 : vector<8x128xf32>
    %cst_56 = arith.constant 2.250000e+00 : f32
    %162 = vector.broadcast %cst_56 : f32 to vector<8x128xf32>
    %163 = arith.mulf %161, %162 : vector<8x128xf32>
    %164 = arith.mulf %163, %82 : vector<8x128xf32>
    %cst_57 = arith.constant 0.111111112 : f32
    %165 = vector.broadcast %cst_57 : f32 to vector<8x128xf32>
    %166 = arith.subf %165, %4 : vector<8x128xf32>
    %cst_58 = arith.constant 2.250000e+00 : f32
    %167 = vector.broadcast %cst_58 : f32 to vector<8x128xf32>
    %168 = arith.mulf %166, %167 : vector<8x128xf32>
    %169 = arith.mulf %168, %93 : vector<8x128xf32>
    %170 = arith.addf %164, %169 : vector<8x128xf32>
    %cst_59 = arith.constant -0.333333343 : f32
    %171 = vector.broadcast %cst_59 : f32 to vector<8x128xf32>
    %172 = arith.subf %4, %171 : vector<8x128xf32>
    %cst_60 = arith.constant 2.250000e+00 : f32
    %173 = vector.broadcast %cst_60 : f32 to vector<8x128xf32>
    %174 = arith.mulf %172, %173 : vector<8x128xf32>
    %175 = arith.mulf %174, %93 : vector<8x128xf32>
    %cst_61 = arith.constant 0.333333343 : f32
    %176 = vector.broadcast %cst_61 : f32 to vector<8x128xf32>
    %177 = arith.subf %176, %4 : vector<8x128xf32>
    %cst_62 = arith.constant 2.250000e+00 : f32
    %178 = vector.broadcast %cst_62 : f32 to vector<8x128xf32>
    %179 = arith.mulf %177, %178 : vector<8x128xf32>
    %180 = arith.mulf %179, %104 : vector<8x128xf32>
    %181 = arith.addf %175, %180 : vector<8x128xf32>
    %cst_63 = arith.constant -0.111111112 : f32
    %182 = vector.broadcast %cst_63 : f32 to vector<8x128xf32>
    %183 = arith.subf %4, %182 : vector<8x128xf32>
    %cst_64 = arith.constant 2.250000e+00 : f32
    %184 = vector.broadcast %cst_64 : f32 to vector<8x128xf32>
    %185 = arith.mulf %183, %184 : vector<8x128xf32>
    %186 = arith.mulf %185, %104 : vector<8x128xf32>
    %cst_65 = arith.constant 0.555555582 : f32
    %187 = vector.broadcast %cst_65 : f32 to vector<8x128xf32>
    %188 = arith.subf %187, %4 : vector<8x128xf32>
    %cst_66 = arith.constant 2.250000e+00 : f32
    %189 = vector.broadcast %cst_66 : f32 to vector<8x128xf32>
    %190 = arith.mulf %188, %189 : vector<8x128xf32>
    %191 = arith.mulf %190, %115 : vector<8x128xf32>
    %192 = arith.addf %186, %191 : vector<8x128xf32>
    %cst_67 = arith.constant 0.111111112 : f32
    %193 = vector.broadcast %cst_67 : f32 to vector<8x128xf32>
    %194 = arith.subf %4, %193 : vector<8x128xf32>
    %cst_68 = arith.constant 2.250000e+00 : f32
    %195 = vector.broadcast %cst_68 : f32 to vector<8x128xf32>
    %196 = arith.mulf %194, %195 : vector<8x128xf32>
    %197 = arith.mulf %196, %115 : vector<8x128xf32>
    %cst_69 = arith.constant 0.777777791 : f32
    %198 = vector.broadcast %cst_69 : f32 to vector<8x128xf32>
    %199 = arith.subf %198, %4 : vector<8x128xf32>
    %cst_70 = arith.constant 2.250000e+00 : f32
    %200 = vector.broadcast %cst_70 : f32 to vector<8x128xf32>
    %201 = arith.mulf %199, %200 : vector<8x128xf32>
    %202 = arith.mulf %201, %126 : vector<8x128xf32>
    %203 = arith.addf %197, %202 : vector<8x128xf32>
    %cst_71 = arith.constant 0.333333343 : f32
    %204 = vector.broadcast %cst_71 : f32 to vector<8x128xf32>
    %205 = arith.subf %4, %204 : vector<8x128xf32>
    %cst_72 = arith.constant 2.250000e+00 : f32
    %206 = vector.broadcast %cst_72 : f32 to vector<8x128xf32>
    %207 = arith.mulf %205, %206 : vector<8x128xf32>
    %208 = arith.mulf %207, %126 : vector<8x128xf32>
    %cst_73 = arith.constant 1.000000e+00 : f32
    %209 = vector.broadcast %cst_73 : f32 to vector<8x128xf32>
    %210 = arith.subf %209, %4 : vector<8x128xf32>
    %cst_74 = arith.constant 2.250000e+00 : f32
    %211 = vector.broadcast %cst_74 : f32 to vector<8x128xf32>
    %212 = arith.mulf %210, %211 : vector<8x128xf32>
    %213 = arith.mulf %212, %137 : vector<8x128xf32>
    %214 = arith.addf %208, %213 : vector<8x128xf32>
    %cst_75 = arith.constant -1.000000e+00 : f32
    %215 = vector.broadcast %cst_75 : f32 to vector<8x128xf32>
    %216 = arith.subf %4, %215 : vector<8x128xf32>
    %cst_76 = arith.constant 1.500000e+00 : f32
    %217 = vector.broadcast %cst_76 : f32 to vector<8x128xf32>
    %218 = arith.mulf %216, %217 : vector<8x128xf32>
    %219 = arith.mulf %218, %148 : vector<8x128xf32>
    %cst_77 = arith.constant -0.111111112 : f32
    %220 = vector.broadcast %cst_77 : f32 to vector<8x128xf32>
    %221 = arith.subf %220, %4 : vector<8x128xf32>
    %cst_78 = arith.constant 1.500000e+00 : f32
    %222 = vector.broadcast %cst_78 : f32 to vector<8x128xf32>
    %223 = arith.mulf %221, %222 : vector<8x128xf32>
    %224 = arith.mulf %223, %159 : vector<8x128xf32>
    %225 = arith.addf %219, %224 : vector<8x128xf32>
    %cst_79 = arith.constant -0.777777791 : f32
    %226 = vector.broadcast %cst_79 : f32 to vector<8x128xf32>
    %227 = arith.subf %4, %226 : vector<8x128xf32>
    %cst_80 = arith.constant 1.500000e+00 : f32
    %228 = vector.broadcast %cst_80 : f32 to vector<8x128xf32>
    %229 = arith.mulf %227, %228 : vector<8x128xf32>
    %230 = arith.mulf %229, %159 : vector<8x128xf32>
    %cst_81 = arith.constant 0.111111112 : f32
    %231 = vector.broadcast %cst_81 : f32 to vector<8x128xf32>
    %232 = arith.subf %231, %4 : vector<8x128xf32>
    %cst_82 = arith.constant 1.500000e+00 : f32
    %233 = vector.broadcast %cst_82 : f32 to vector<8x128xf32>
    %234 = arith.mulf %232, %233 : vector<8x128xf32>
    %235 = arith.mulf %234, %170 : vector<8x128xf32>
    %236 = arith.addf %230, %235 : vector<8x128xf32>
    %cst_83 = arith.constant -0.555555582 : f32
    %237 = vector.broadcast %cst_83 : f32 to vector<8x128xf32>
    %238 = arith.subf %4, %237 : vector<8x128xf32>
    %cst_84 = arith.constant 1.500000e+00 : f32
    %239 = vector.broadcast %cst_84 : f32 to vector<8x128xf32>
    %240 = arith.mulf %238, %239 : vector<8x128xf32>
    %241 = arith.mulf %240, %170 : vector<8x128xf32>
    %cst_85 = arith.constant 0.333333343 : f32
    %242 = vector.broadcast %cst_85 : f32 to vector<8x128xf32>
    %243 = arith.subf %242, %4 : vector<8x128xf32>
    %cst_86 = arith.constant 1.500000e+00 : f32
    %244 = vector.broadcast %cst_86 : f32 to vector<8x128xf32>
    %245 = arith.mulf %243, %244 : vector<8x128xf32>
    %246 = arith.mulf %245, %181 : vector<8x128xf32>
    %247 = arith.addf %241, %246 : vector<8x128xf32>
    %cst_87 = arith.constant -0.333333343 : f32
    %248 = vector.broadcast %cst_87 : f32 to vector<8x128xf32>
    %249 = arith.subf %4, %248 : vector<8x128xf32>
    %cst_88 = arith.constant 1.500000e+00 : f32
    %250 = vector.broadcast %cst_88 : f32 to vector<8x128xf32>
    %251 = arith.mulf %249, %250 : vector<8x128xf32>
    %252 = arith.mulf %251, %181 : vector<8x128xf32>
    %cst_89 = arith.constant 0.555555582 : f32
    %253 = vector.broadcast %cst_89 : f32 to vector<8x128xf32>
    %254 = arith.subf %253, %4 : vector<8x128xf32>
    %cst_90 = arith.constant 1.500000e+00 : f32
    %255 = vector.broadcast %cst_90 : f32 to vector<8x128xf32>
    %256 = arith.mulf %254, %255 : vector<8x128xf32>
    %257 = arith.mulf %256, %192 : vector<8x128xf32>
    %258 = arith.addf %252, %257 : vector<8x128xf32>
    %cst_91 = arith.constant -0.111111112 : f32
    %259 = vector.broadcast %cst_91 : f32 to vector<8x128xf32>
    %260 = arith.subf %4, %259 : vector<8x128xf32>
    %cst_92 = arith.constant 1.500000e+00 : f32
    %261 = vector.broadcast %cst_92 : f32 to vector<8x128xf32>
    %262 = arith.mulf %260, %261 : vector<8x128xf32>
    %263 = arith.mulf %262, %192 : vector<8x128xf32>
    %cst_93 = arith.constant 0.777777791 : f32
    %264 = vector.broadcast %cst_93 : f32 to vector<8x128xf32>
    %265 = arith.subf %264, %4 : vector<8x128xf32>
    %cst_94 = arith.constant 1.500000e+00 : f32
    %266 = vector.broadcast %cst_94 : f32 to vector<8x128xf32>
    %267 = arith.mulf %265, %266 : vector<8x128xf32>
    %268 = arith.mulf %267, %203 : vector<8x128xf32>
    %269 = arith.addf %263, %268 : vector<8x128xf32>
    %cst_95 = arith.constant 0.111111112 : f32
    %270 = vector.broadcast %cst_95 : f32 to vector<8x128xf32>
    %271 = arith.subf %4, %270 : vector<8x128xf32>
    %cst_96 = arith.constant 1.500000e+00 : f32
    %272 = vector.broadcast %cst_96 : f32 to vector<8x128xf32>
    %273 = arith.mulf %271, %272 : vector<8x128xf32>
    %274 = arith.mulf %273, %203 : vector<8x128xf32>
    %cst_97 = arith.constant 1.000000e+00 : f32
    %275 = vector.broadcast %cst_97 : f32 to vector<8x128xf32>
    %276 = arith.subf %275, %4 : vector<8x128xf32>
    %cst_98 = arith.constant 1.500000e+00 : f32
    %277 = vector.broadcast %cst_98 : f32 to vector<8x128xf32>
    %278 = arith.mulf %276, %277 : vector<8x128xf32>
    %279 = arith.mulf %278, %214 : vector<8x128xf32>
    %280 = arith.addf %274, %279 : vector<8x128xf32>
    %c0_99 = arith.constant 0 : index
    %c0_100 = arith.constant 0 : index
    %281 = vector.load %arg4[%c0_99, %c0_100] : memref<56x128xf32, #tpu.memory_space<vmem>>, vector<8x128xf32>
    tpu.vector_store %arg4[%c0_99, %c0_100], %225 {strides = array<i32>} : memref<56x128xf32, #tpu.memory_space<vmem>>, vector<8x128xf32>,
    %c8 = arith.constant 8 : index
    %c0_101 = arith.constant 0 : index
    %282 = vector.load %arg4[%c8, %c0_101] : memref<56x128xf32, #tpu.memory_space<vmem>>, vector<8x128xf32>
    tpu.vector_store %arg4[%c8, %c0_101], %236 {strides = array<i32>} : memref<56x128xf32, #tpu.memory_space<vmem>>, vector<8x128xf32>,
    %c16 = arith.constant 16 : index
    %c0_102 = arith.constant 0 : index
    %283 = vector.load %arg4[%c16, %c0_102] : memref<56x128xf32, #tpu.memory_space<vmem>>, vector<8x128xf32>
    tpu.vector_store %arg4[%c16, %c0_102], %247 {strides = array<i32>} : memref<56x128xf32, #tpu.memory_space<vmem>>, vector<8x128xf32>,
    %c24 = arith.constant 24 : index
    %c0_103 = arith.constant 0 : index
    %284 = vector.load %arg4[%c24, %c0_103] : memref<56x128xf32, #tpu.memory_space<vmem>>, vector<8x128xf32>
    tpu.vector_store %arg4[%c24, %c0_103], %258 {strides = array<i32>} : memref<56x128xf32, #tpu.memory_space<vmem>>, vector<8x128xf32>,
    %c32 = arith.constant 32 : index
    %c0_104 = arith.constant 0 : index
    %285 = vector.load %arg4[%c32, %c0_104] : memref<56x128xf32, #tpu.memory_space<vmem>>, vector<8x128xf32>
    tpu.vector_store %arg4[%c32, %c0_104], %269 {strides = array<i32>} : memref<56x128xf32, #tpu.memory_space<vmem>>, vector<8x128xf32>,
    %c40 = arith.constant 40 : index
    %c0_105 = arith.constant 0 : index
    %286 = vector.load %arg4[%c40, %c0_105] : memref<56x128xf32, #tpu.memory_space<vmem>>, vector<8x128xf32>
    tpu.vector_store %arg4[%c40, %c0_105], %280 {strides = array<i32>} : memref<56x128xf32, #tpu.memory_space<vmem>>, vector<8x128xf32>,
    %287 = arith.mulf %0, %0 : vector<8x128xf32>
    %c48 = arith.constant 48 : index
    %c0_106 = arith.constant 0 : index
    %288 = vector.load %arg4[%c48, %c0_106] : memref<56x128xf32, #tpu.memory_space<vmem>>, vector<8x128xf32>
    tpu.vector_store %arg4[%c48, %c0_106], %287 {strides = array<i32>} : memref<56x128xf32, #tpu.memory_space<vmem>>, vector<8x128xf32>,
    %c0_107 = arith.constant 0 : index
    %c0_108 = arith.constant 0 : index
    %289 = vector.load %arg4[%c0_107, %c0_108] : memref<56x128xf32, #tpu.memory_space<vmem>>, vector<56x128xf32>
    %c0_109 = arith.constant 0 : index
    %c0_110 = arith.constant 0 : index
    %290 = vector.load %arg2[%c0_109, %c0_110] : memref<56x56xf32, #tpu.memory_space<vmem>>, vector<56x56xf32>
    %cst_111 = arith.constant dense<0.000000e+00> : vector<128x56xf32>
    %291 = tpu.matmul %289, %290, %cst_111 {dimension_numbers = #tpu.dot_dimension_numbers<[0], [0], [1], [1], [0, 1, 1, 1], [], []>} : vector<56x128xf32>, vector<56x56xf32>, vector<128x56xf32> -> vector<128x56xf32>
    %c0_112 = arith.constant 0 : index
    %c0_113 = arith.constant 0 : index
    %292 = vector.load %arg3[%c0_112, %c0_113] : memref<128x56xf32, #tpu.memory_space<vmem>>, vector<128x56xf32>
    tpu.vector_store %arg3[%c0_112, %c0_113], %291 {strides = array<i32>} : memref<128x56xf32, #tpu.memory_space<vmem>>, vector<128x56xf32>,
    return
  }
  func.func @transform_0(%arg0: i32) -> (i32, i32) {
    %c0_i32 = arith.constant 0 : i32
    %c0_i32_0 = arith.constant 0 : i32
    return %c0_i32, %arg0 : i32, i32
  }
  func.func @transform_1(%arg0: i32) -> (i32, i32) {
    %c0_i32 = arith.constant 0 : i32
    %c0_i32_0 = arith.constant 0 : i32
    %c0_i32_1 = arith.constant 0 : i32
    return %c0_i32, %c0_i32_0 : i32, i32
  }
  func.func @transform_2(%arg0: i32) -> (i32, i32) {
    %c0_i32 = arith.constant 0 : i32
    %c0_i32_0 = arith.constant 0 : i32
    return %arg0, %c0_i32 : i32, i32
  }
}

</mosaic_0001>

<bundles_post_ra>
// kernel: tpu_custom_call.1
= control target key start
LH: loop header
LB: loop body
LE: loop exit
PB: predicated region body
PF: predicated region fallthrough
CT: control target
= control target key end

     0   :  { %7 = vsyncpa [#allocation4], 0  ;;  %s1205_s0 = inlined_call_operand.hbm [shape: f32[8,256], index: 0, kind: input, shape index: {}]   ;;  %s1206_s1 = inlined_call_operand.hbm [shape: f32[56,56], index: 1, kind: input, shape index: {}]   ;;  %s1207_s2 = inlined_call_operand.vmem [shape: f32[256,56], index: 2, kind: output, shape index: {}]  }
   0x1   :  { %9 = vsyncpa [#allocation4 + $0x1], 0 }
   0x2   :  { %10 = vsyncpa [#allocation6], 0  ;;  %s962_s9 = smov 0   ;;  %s964_s10 = smov 0  }
   0x3   :  { %s966_s11 = smov 0   ;;  %s968_s12 = smov 0  }
   0x4 LB: > { %s672_s13 = sadd.s32 4294967295, %s940_s12   ;;  %p36_p0 = scmp.ne.s32.totalorder %s932_s10, %s928_s9  ;;  %s940_s12 = sphi %s968_s12, %s1223_s12   ;;  %s936_s11 = sphi %s966_s11, %s1222_s11   ;;  %s932_s10 = sphi %s964_s10, %s1221_s10   ;;  %s928_s9 = sphi %s962_s9, %s1220_s9  }
   0x5   : > { %p984_p1 = scmp.eq.s32.totalorder %s672_s13, 0  ;;  %p674_p2 = scmp.ge.s32.totalorder %s940_s12, 1 }
   0x6   : > { %p94_p3 = scmp.lt.s32.totalorder %s940_s12, 3  ;;  %s942_s17 = smov [#allocation5]  }
   0x7   : > { %s1212_s14 = scalar_select %p984_p1, 1, 0 }
   0x8   : > { %p992_p4 = por %p984_p1, %p36_p0  ;;  %p996_p5 = pnand %p674_p2, %p94_p3 }
   0x9   : > { %s106_s18 = sshll.u32 %s942_s17, 4  ;;  %s1009_s20 = sadd.s32 1, %s940_s12   ;;  %s107_s18 = int_to_ptr.vmem [resolvable:$true] %s106_s18 }
   0xa   : > { %s1213_s15 = scalar_select %p992_p4, 1, 0 }
   0xb   : > { %s1214_s16 = scalar_select %p996_p5, 1, 0 }
   0xc   : > { %p801_p6 = pneg %p996_p5  ;;  %s23_s21 = sadd.s32 1, %s936_s11 }
   0xd   : > { %s20_s22 = ssub.s32 %s940_s12, %s1009_s20  ;;  %s859_s23 = scalar_lea.vmem %s107_s18, 896 }
   0xe   : > { %p1004_p7 = pnand %p801_p6, %p984_p1  ;;  %p860_p9 = scmp.ne.s32.totalorder %s107_s18, %s859_s23 }
   0xf   : > { %p867_p12 = scmp.lt.s32.totalorder %s107_s18, %s107_s18  ;;  %p868_p13 = scmp.lt.s32.totalorder %s859_s23, %s859_s23 }
  0x10   : > { %p850_p8 = pneg %p1004_p7 }
  0x11   : > { %p869_p0 = por %p868_p13, %p867_p12 }
  0x12   : > { %p862_p10 = pnand %p860_p9, %p850_p8 }
  0x14   : > { %p863_p11 = pneg %p862_p10 }
  0x16   : > { %p870_p2 = pnand %p869_p0, %p863_p11 }
  0x18   : > { %873 = shalt.err (!%p870_p2)
}
  0x19   : > { %s943_s24 = smov 128   ;;  %s944_s25 = smov 8  }
  0x1a   : > { %804 = dma.hbm_to_vmem [thread:$0]  (!%p1004_p7), %s1206_s1, 896, %s107_s18, [#allocation6], %s943_s24, %s943_s24, %s944_s25  }
  0x1b   : > { %p21_p3 = scmp.eq.s32.totalorder %s20_s22, 0  ;;  %p30_p6 = scmp.ne.s32.totalorder %s936_s11, %s932_s10 }
  0x1c   : > { %p31_p8 = scmp.eq.s32.totalorder %s940_s12, 0  ;;  %p810_p9 = scmp.lt.s32.totalorder %s940_s12, 2 }
  0x1d   : > { %s1026_s28 = scalar_select %p21_p3, %s936_s11, %s23_s21  }
  0x1e   : > { %p32_p10 = por %p31_p8, %p30_p6  ;;  %s120_s29 = sand.u32 1, %s936_s11  }
  0x1f   : > { %s677_s30 = sshll.u32 %s120_s29, 3  ;;  %s678_s3 = sshll.u32 %s940_s12, 7 }
  0x20   : > { %s1033_s6 = scalar_lea.hbm %s1205_s0, %s678_s3  ;;  %s124_s7 = scalar_lea.vmem [#allocation3], %s677_s30 }
  0x21   : > { %s131_s8 = sshll.u32 %s124_s7, 4  ;;  %p1035_p7 = pnand %p810_p9, %p32_p10  ;;  %s132_s8 = int_to_ptr.vmem [resolvable:$true] %s131_s8 }
  0x22   : > { %s121_s17 = scalar_lea.sflag [#allocation4], %s120_s29  ;;  %s874_s18 = scalar_lea.hbm %s1033_s6, 128 }
  0x23   : > { %p875_p11 = scmp.ne.s32.totalorder %s1033_s6, %s874_s18  ;;  %p876_p12 = pneg %p1035_p7 }
  0x24   : > { %s879_s22 = scalar_lea.hbm %s1205_s0, 256  ;;  %p880_p2 = scmp.lt.s32.totalorder %s1033_s6, %s1205_s0 }
  0x25   : > { %p877_p13 = pnand %p876_p12, %p875_p11  ;;  %p881_p3 = scmp.lt.s32.totalorder %s879_s22, %s874_s18 }
  0x27   : > { %p878_p0 = pneg %p877_p13  ;;  %p882_p6 = por %p881_p3, %p880_p2 }
  0x29   : > { %p883_p8 = pnand %p882_p6, %p878_p0 }
  0x2b   : > { %886 = shalt.err (!%p883_p8)
}
  0x2c   : > { %s887_s25 = scalar_lea.vmem %s132_s8, 128  ;;  %s945_s26 = smov [#allocation3]  }
  0x2d   : > { %p888_p9 = scmp.ne.s32.totalorder %s132_s8, %s887_s25  ;;  %s892_s27 = sshll.u32 %s945_s26, 4  ;;  %s893_s27 = int_to_ptr.vmem [resolvable:$false] %s892_s27 }
  0x2e   : > { %s894_s29 = scalar_lea.vmem %s893_s27, 256  ;;  %p895_p11 = scmp.lt.s32.totalorder %s132_s8, %s893_s27 }
  0x2f   : > { %p890_p10 = pnand %p888_p9, %p876_p12  ;;  %p896_p13 = scmp.lt.s32.totalorder %s894_s29, %s887_s25 }
  0x31   : > { %p891_p1 = pneg %p890_p10  ;;  %p897_p4 = por %p896_p13, %p895_p11 }
  0x33   : > { %p898_p5 = pnand %p897_p4, %p891_p1 }
  0x35   : > { %901 = shalt.err (!%p898_p5)
}
  0x36   : > { %808 = dma.hbm_to_vmem [thread:$0]  (!%p1035_p7), %s1033_s6, 128, %s132_s8, %s121_s17  }
  0x37   : > { %p1217_p0 = scmp.ne.s32.totalorder %s1214_s16, 0 }
  0x38   : > { %s142_s30 = sand.u32 (!%p1217_p0), 1, %s932_s10   ;;  %p1218_p12 = scmp.ne.s32.totalorder (!%p1217_p0), %s1213_s15, 0 }
  0x39   : > { %140 = sbr.rel (%p1217_p0) target bundleno = 475 (0x1db), region = 28  ;;  %s680_s3 = sshll.u32 (!%p1217_p0), %s142_s30, 3 }
  0x3a   : > { %s143_s4 = scalar_lea.sflag (!%p1217_p0), [#allocation4], %s142_s30  ;;  %s146_s5 = scalar_lea.vmem (!%p1217_p0), [#allocation3], %s680_s3 }
  0x3e   : > { %919 = dma.done.wait (%p1218_p12), %s143_s4, 128  }
  0x3f   : > { %921 = vsyncadd (%p1218_p12), %s143_s4, 4294967168  ;;  %p1219_p1 = scmp.ne.s32.totalorder %s1212_s14, 0 }
  0x41   : > { %923 = dma.done.wait (%p1219_p1), [#allocation6], 896  }
  0x42   : > { %925 = vsyncadd (%p1219_p1), [#allocation6], 4294966400  ;;  %v1064_v0 = vld [vmem:[%s146_s5] sm:$0xff]  ;;  %v351_v2 = vld [vmem:[#allocation5 + $0x28] sm:$0xff]  ;;  %v946_v45 = vmov 0.0   ;;  %vm385_vm9 = vcmask 457728  }
  0x43   : > { %v352_v1 = vld [vmem:[#allocation5 + $0x30] sm:$0xff]  ;;  %v1067_v3 = vclamps-f32 %v1064_v0, 1.0  ;;  %v350_v4 = vld [vmem:[#allocation5 + $0x20] sm:$0xff]  ;;  %v349_v8 = vld [vmem:[#allocation5 + $0x18] sm:$0xff]  ;;  %s682_s14 = sshll.u32 %s672_s13, 4 }
  0x44   : > { %743 = vmatprep.subr.mxu0 %v352_v1  ;;  %781 = vmatprep.subr.mxu1 %v352_v1  ;;  %v348_v20 = vld [vmem:[#allocation5 + $0x10] sm:$0xff]  ;;  %p172_p4 = scmp.lt.s32.totalorder %s682_s14, 31 }
  0x45   : > { %744 = vmatpush3.msra.mxu0 %v352_v1  ;;  %788 = vmatpush3.msra.mxu1 %v352_v1  ;;  %v685_v5 = vadd.f32 1.0, %v1067_v3  ;;  %v213_v6 = vsub.f32 -0.5555556, %v1067_v3  ;;  %v695_v7 = vadd.f32 0.7777778, %v1067_v3 }
  0x46   : > { %745 = vmatprep.subr.mxu0 %v351_v2  ;;  %782 = vmatprep.subr.mxu1 %v351_v2  ;;  %v220_v9 = vsub.f32 -0.33333334, %v1067_v3  ;;  %v696_v10 = vadd.f32 0.5555556, %v1067_v3  ;;  %v227_v11 = vsub.f32 -0.11111111, %v1067_v3 }
  0x47   : > { %746 = vmatpush3.msra.mxu0 %v351_v2  ;;  %789 = vmatpush3.msra.mxu1 %v351_v2  ;;  %v181_v12 = vmul.f32 4.5, %v685_v5  ;;  %v214_v13 = vmul.f32 4.5, %v213_v6  ;;  %v218_v14 = vmul.f32 4.5, %v695_v7  ;;  %v1075_v15 = vmul.f32 2.25, %v685_v5  ;;  %s1225_s14 = smov (!%p172_p4, %s682_s14), 31 }
  0x48   : > { %747 = vmatprep.subr.mxu0 %v350_v4  ;;  %783 = vmatprep.subr.mxu1 %v350_v4  ;;  %v221_v16 = vmul.f32 4.5, %v220_v9  ;;  %v225_v17 = vmul.f32 4.5, %v696_v10  ;;  %v228_v18 = vmul.f32 4.5, %v227_v11  ;;  %v268_v19 = vmul.f32 2.25, %v220_v9  ;;  %s683_s15 = sshll.u32 %s1225_s14, 3 }
  0x49   : > { %748 = vmatpush3.msra.mxu0 %v350_v4  ;;  %790 = vmatpush3.msra.mxu1 %v350_v4  ;;  %v182_v21 = vfloor.f32 %v181_v12  ;;  %v271_v22 = vmul.f32 2.25, %v695_v7  ;;  %v273_v23 = vmul.f32 2.25, %v227_v11  ;;  %v1077_v24 = vmul.f32 1.5, %v685_v5  ;;  %s1158_s7 = scalar_lea.vmem %s1207_s2, %s683_s15 }
  0x4a   : > { %749 = vmatprep.subr.mxu0 %v349_v8  ;;  %784 = vmatprep.subr.mxu1 %v349_v8  ;;  %v1079_v25 = vmul.f32 1.5, %v227_v11  ;;  %v1082_v26 = vadd.f32 0.33333334, %v1067_v3  ;;  %v234_v27 = vsub.f32 0.11111111, %v1067_v3  ;;  %v276_v28 = vmul.f32 2.25, %v696_v10 }
  0x4b   : > { %750 = vmatpush3.msra.mxu0 %v349_v8  ;;  %791 = vmatpush3.msra.mxu1 %v349_v8  ;;  %v183_v29 = vmax.f32 %v182_v21, 0.0  ;;  %v1085_v30 = vmul.f32 1.5, %v695_v7  ;;  %v1088_v31 = vadd.f32 0.11111111, %v1067_v3  ;;  %v241_v32 = vsub.f32 0.33333334, %v1067_v3 }
  0x4c   : > { %751 = vmatprep.subr.mxu0 %v348_v20  ;;  %785 = vmatprep.subr.mxu1 %v348_v20  ;;  %v232_v33 = vmul.f32 4.5, %v1082_v26  ;;  %v235_v34 = vmul.f32 4.5, %v234_v27  ;;  %v278_v35 = vmul.f32 2.25, %v234_v27  ;;  %v1092_v36 = vmul.f32 1.5, %v234_v27 }
  0x4d   : > { %752 = vmatpush3.msra.mxu0 %v348_v20  ;;  %792 = vmatpush3.msra.mxu1 %v348_v20  ;;  %v1094_v37 = vmin.f32 %v183_v29, 8.0  ;;  %v239_v38 = vmul.f32 4.5, %v1088_v31  ;;  %v242_v39 = vmul.f32 4.5, %v241_v32  ;;  %v281_v40 = vmul.f32 2.25, %v1082_v26  ;;  %v347_v29 = vld [vmem:[#allocation5 + $0x8] sm:$0xff] }
  0x4e   : > { %v283_v41 = vmul.f32 2.25, %v241_v32  ;;  %v311_v42 = vmul.f32 1.5, %v696_v10  ;;  %v313_v43 = vmul.f32 1.5, %v241_v32  ;;  %v1099_v44 = vadd.f32 -0.11111111, %v1067_v3  ;;  %753 = vmatprep.subr.mxu0 %v347_v29  ;;  %786 = vmatprep.subr.mxu1 %v347_v29 }
  0x4f   : > { %vm185_vm0 = vcmp.eq.f32.partialorder %v1094_v37, 0.0  ;;  %vm188_vm1 = vcmp.eq.f32.partialorder %v1094_v37, 1.0  ;;  %vm191_vm2 = vcmp.eq.f32.partialorder %v1094_v37, 2.0  ;;  %vm194_vm3 = vcmp.eq.f32.partialorder %v1094_v37, 3.0  ;;  %754 = vmatpush3.msra.mxu0 %v347_v29  ;;  %793 = vmatpush3.msra.mxu1 %v347_v29 }
  0x50   : > { %v686_v46 = vsel %vm185_vm0, 1.0, %v946_v45  ;;  %v687_v47 = vsel %vm188_vm1, 1.0, %v946_v45  ;;  %v688_v48 = vsel %vm191_vm2, 1.0, %v946_v45  ;;  %v689_v49 = vsel %vm194_vm3, 1.0, %v946_v45 }
  0x51   : > { %v212_v50 = vmul.f32 %v686_v46, %v181_v12  ;;  %v215_v51 = vmul.f32 %v687_v47, %v214_v13  ;;  %v219_v52 = vmul.f32 %v687_v47, %v218_v14  ;;  %v222_v53 = vmul.f32 %v688_v48, %v221_v16 }
  0x52   : > { %v226_v54 = vmul.f32 %v688_v48, %v225_v17  ;;  %v229_v55 = vmul.f32 %v689_v49, %v228_v18  ;;  %vm197_vm4 = vcmp.eq.f32.partialorder %v1094_v37, 4.0  ;;  %v233_v56 = vmul.f32 %v689_v49, %v232_v33 }
  0x53   : > { %v216_v57 = vadd.f32 %v215_v51, %v212_v50  ;;  %v223_v58 = vadd.f32 %v222_v53, %v219_v52  ;;  %v690_v59 = vsel %vm197_vm4, 1.0, %v946_v45  ;;  %vm200_vm5 = vcmp.eq.f32.partialorder %v1094_v37, 5.0 }
  0x54   : > { %v230_v60 = vadd.f32 %v229_v55, %v226_v54  ;;  %v236_v61 = vmul.f32 %v690_v59, %v235_v34  ;;  %v691_v62 = vsel %vm200_vm5, 1.0, %v946_v45  ;;  %v240_v63 = vmul.f32 %v690_v59, %v239_v38  ;;  %v346_v38 = vld [vmem:[#allocation5] sm:$0xff] }
  0x55   : > { %v267_v1 = vmul.f32 %v1075_v15, %v216_v57  ;;  %v269_v2 = vmul.f32 %v268_v19, %v223_v58  ;;  %v272_v4 = vmul.f32 %v271_v22, %v223_v58  ;;  %v243_v5 = vmul.f32 %v691_v62, %v242_v39  ;;  %755 = vmatprep.subr.mxu0 %v346_v38 }
  0x56   : > { %v274_v6 = vmul.f32 %v273_v23, %v230_v60  ;;  %v237_v7 = vadd.f32 %v236_v61, %v233_v56  ;;  %v277_v8 = vmul.f32 %v276_v28, %v230_v60  ;;  %vm203_vm6 = vcmp.eq.f32.partialorder %v1094_v37, 6.0  ;;  %756 = vmatpush3.msra.mxu0 %v346_v38  ;;  %787 = vmatprep.subr.mxu1 %v346_v38 }
  0x57   : > { %v270_v9 = vadd.f32 %v269_v2, %v267_v1  ;;  %v244_v10 = vadd.f32 %v243_v5, %v240_v63  ;;  %v692_v11 = vsel %vm203_vm6, 1.0, %v946_v45  ;;  %v246_v12 = vmul.f32 4.5, %v1099_v44  ;;  %794 = vmatpush3.msra.mxu1 %v346_v38 }
  0x58   : > { %v275_v13 = vadd.f32 %v274_v6, %v272_v4  ;;  %v279_v14 = vmul.f32 %v278_v35, %v237_v7  ;;  %v282_v16 = vmul.f32 %v281_v40, %v237_v7  ;;  %v248_v17 = vsub.f32 0.5555556, %v1067_v3 }
  0x59   : > { %v302_v15 = vmul.f32 %v1077_v24, %v270_v9  ;;  %v284_v18 = vmul.f32 %v283_v41, %v244_v10  ;;  %v247_v19 = vmul.f32 %v691_v62, %v246_v12  ;;  %v286_v20 = vmul.f32 2.25, %v1088_v31 }
  0x5a   : > { %v304_v21 = vmul.f32 %v1079_v25, %v275_v13  ;;  %v280_v22 = vadd.f32 %v279_v14, %v277_v8  ;;  %v307_v23 = vmul.f32 %v1085_v30, %v275_v13  ;;  %v249_v27 = vmul.f32 4.5, %v248_v17 }
  0x5b   : > { %v285_v28 = vadd.f32 %v284_v18, %v282_v16  ;;  %v288_v35 = vmul.f32 2.25, %v248_v17  ;;  %v316_v40 = vmul.f32 1.5, %v1082_v26  ;;  %vm206_vm7 = vcmp.eq.f32.partialorder %v1094_v37, 7.0 }
  0x5c   : > { %v305_v32 = vadd.f32 %v304_v21, %v302_v15  ;;  %v309_v33 = vmul.f32 %v1092_v36, %v280_v22  ;;  %v250_v34 = vmul.f32 %v692_v11, %v249_v27  ;;  %v312_v24 = vmul.f32 %v311_v42, %v280_v22 }
  0x5d   : > { %v314_v39 = vmul.f32 %v313_v43, %v285_v28  ;;  %v287_v41 = vmul.f32 %v286_v20, %v244_v10  ;;  %v700_v46 = vadd.f32 -0.33333334, %v1067_v3  ;;  %v318_v36 = vmul.f32 1.5, %v248_v17 }
  0x5e   : > { %353 = vxpose.xlu0.b32.start [1/7] (short) %v305_v32, 128  ;;  %v310_v25 = vadd.f32 %v309_v33, %v307_v23  ;;  %v251_v30 = vadd.f32 %v250_v34, %v247_v19  ;;  %v693_v47 = vsel %vm206_vm7, 1.0, %v946_v45  ;;  %v255_v48 = vsub.f32 0.7777778, %v1067_v3 }
  0x5f   : > { %v262_v42 = vsub.f32 1.0, %v1067_v3  ;;  %v253_v43 = vmul.f32 4.5, %v700_v46  ;;  %vm209_vm8 = vcmp.eq.f32.partialorder %v1094_v37, 8.0  ;;  %v701_v49 = vadd.f32 -0.5555556, %v1067_v3 }
  0x60   : > { %v289_v26 = vmul.f32 %v288_v35, %v251_v30  ;;  %v315_v50 = vadd.f32 %v314_v39, %v312_v24  ;;  %v317_v51 = vmul.f32 %v316_v40, %v285_v28  ;;  %v256_v52 = vmul.f32 4.5, %v255_v48 }
  0x61   : > { %v291_v53 = vmul.f32 2.25, %v1099_v44  ;;  %v254_v55 = vmul.f32 %v692_v11, %v253_v43  ;;  %v694_v56 = vsel %vm209_vm8, 1.0, %v946_v45  ;;  %v260_v57 = vmul.f32 4.5, %v701_v49 }
  0x62   : > { %354 = vxpose.xlu0.b32.cont [2/7] (short) %v310_v25, 128  ;;  %v290_v54 = vadd.f32 %v289_v26, %v287_v41  ;;  %v257_v58 = vmul.f32 %v693_v47, %v256_v52  ;;  %v293_v59 = vmul.f32 2.25, %v255_v48  ;;  %v263_v60 = vmul.f32 4.5, %v262_v42 }
  0x63   : > { %v296_v61 = vmul.f32 2.25, %v700_v46  ;;  %v321_v3 = vmul.f32 1.5, %v1088_v31  ;;  %v261_v62 = vmul.f32 %v693_v47, %v260_v57  ;;  %v292_v1 = vmul.f32 %v291_v53, %v251_v30 }
  0x64   : > { %v319_v37 = vmul.f32 %v318_v36, %v290_v54  ;;  %v258_v63 = vadd.f32 %v257_v58, %v254_v55  ;;  %v264_v2 = vmul.f32 %v694_v56, %v263_v60  ;;  %v298_v4 = vmul.f32 2.25, %v262_v42 }
  0x65   : > { %v323_v6 = vmul.f32 1.5, %v255_v48  ;;  %v326_v45 = vmul.f32 1.5, %v1099_v44  ;;  %v322_v11 = vmul.f32 %v321_v3, %v290_v54  ;;  %v328_v13 = vmul.f32 1.5, %v262_v42 }
  0x66   : > { %355 = vxpose.xlu0.b32.cont [3/7] (short) %v315_v50, 128  ;;  %v320_v5 = vadd.f32 %v319_v37, %v317_v51  ;;  %v294_v7 = vmul.f32 %v293_v59, %v258_v63  ;;  %v265_v8 = vadd.f32 %v264_v2, %v261_v62  ;;  %v297_v9 = vmul.f32 %v296_v61, %v258_v63 }
  0x67   : > { %v337_v19 = vmul.f32 %v1064_v0, %v1064_v0 }
  0x68   : > { %v295_v10 = vadd.f32 %v294_v7, %v292_v1  ;;  %v299_v12 = vmul.f32 %v298_v4, %v265_v8 }
  0x6a   : > { %356 = vxpose.xlu0.b32.cont [4/7] (short) %v320_v5, 128  ;;  %v324_v14 = vmul.f32 %v323_v6, %v295_v10  ;;  %v300_v31 = vadd.f32 %v299_v12, %v297_v9  ;;  %v327_v16 = vmul.f32 %v326_v45, %v295_v10 }
  0x6c   : > { %v325_v17 = vadd.f32 %v324_v14, %v322_v11  ;;  %v329_v15 = vmul.f32 %v328_v13, %v300_v31 }
  0x6e   : > { %357 = vxpose.xlu0.b32.cont [5/7] (short) %v325_v17, 128  ;;  %v330_v18 = vadd.f32 %v329_v15, %v327_v16 }
  0x72   : > { %358 = vxpose.xlu0.b32.cont [6/7] (short) %v330_v18, 128 }
  0x76   : > { %359 = vxpose.xlu0.b32.end [7/7] (short) %v337_v19, 128 }
  0xda   : > { %v369_v20 = vpop.trf.xlu0 }
  0xdb   : > { %757 = vmatprep.mubr.msk.f32.mxu0 %vm385_vm9, %v369_v20 }
  0xde   : > { %v370_v44 = vpop.trf.xlu0 }
  0xdf   : > { %758 = vmatmul.mubr.msk.f32.vlgmr.msra.gmra.mxu0 %vm385_vm9, %v370_v44 }
  0xe2   : > { %v371_v21 = vpop.trf.xlu0 }
  0xe3   : > { %760 = vmatprep.mubr.msk.f32.mxu0 %vm385_vm9, %v371_v21 }
  0xe6   : > { %v372_v22 = vpop.trf.xlu0 }
  0xe7   : > { %761 = vmatmul.mubr.msk.f32.gmra.mxu0 %vm385_vm9, %v372_v22 }
  0xea   : > { %v373_v23 = vpop.trf.xlu0 }
  0xeb   : > { %763 = vmatprep.mubr.msk.f32.mxu0 %vm385_vm9, %v373_v23 }
  0xee   : > { %v374_v27 = vpop.trf.xlu0 }
  0xef   : > { %764 = vmatmul.mubr.msk.f32.gmra.mxu0 %vm385_vm9, %v374_v27 }
  0xf2   : > { %v375_v0 = vpop.trf.xlu0 }
  0xf3   : > { %766 = vmatprep.mubr.msk.f32.mxu0 %vm385_vm9, %v375_v0 }
  0xf6   : > { %v376_v28 = vpop.trf.xlu0 }
  0xf7   : > { %767 = vmatmul.mubr.msk.f32.gmra.mxu0 %vm385_vm9, %v376_v28 }
  0xfa   : > { %v377_v29 = vpop.trf.xlu0 }
  0xfb   : > { %769 = vmatprep.mubr.msk.f32.mxu1 %vm385_vm9, %v377_v29 }
  0xfe   : > { %v378_v32 = vpop.trf.xlu0 }
  0xff   : > { %770 = vmatmul.mubr.msk.f32.vlgmr.msra.gmra.mxu1 %vm385_vm9, %v378_v32 }
 0x102   : > { %v379_v33 = vpop.trf.xlu0 }
 0x103   : > { %772 = vmatprep.mubr.msk.f32.mxu1 %vm385_vm9, %v379_v33 }
 0x106   : > { %v380_v34 = vpop.trf.xlu0 }
 0x107   : > { %773 = vmatmul.mubr.msk.f32.gmra.mxu1 %vm385_vm9, %v380_v34 }
 0x10a   : > { %v381_v35 = vpop.trf.xlu0 }
 0x10b   : > { %775 = vmatprep.mubr.msk.f32.mxu1 %vm385_vm9, %v381_v35 }
 0x10e   : > { %v382_v38 = vpop.trf.xlu0 }
 0x10f   : > { %776 = vmatmul.mubr.msk.f32.gmra.mxu1 %vm385_vm9, %v382_v38 }
 0x112   : > { %v383_v24 = vpop.trf.xlu0 }
 0x113   : > { %778 = vmatprep.mubr.msk.f32.mxu1 %vm385_vm9, %v383_v24 }
 0x116   : > { %v384_v39 = vpop.trf.xlu0 }
 0x117   : > { %779 = vmatmul.mubr.msk.f32.gmra.mxu1 %vm385_vm9, %v384_v39 }
 0x19f   : > { %v759_v40 = vpop.f32.mrf.mxu0 }
 0x1a0   : > { %580 = vst.msk [vmem:[%s1158_s7 + $0x8] sm:$0xff] %vm385_vm9, %v759_v40 }
 0x1a1   : > { %v500_v25 = vpop.f32.mrf.mxu0 }
 0x1a2   : > { %579 = vst.msk [vmem:[%s1158_s7] sm:$0xff] %vm385_vm9, %v500_v25 }
 0x1a7   : > { %v762_v30 = vpop.f32.mrf.mxu0 }
 0x1a8   : > { %582 = vst.msk [vmem:[%s1158_s7 + $0x18] sm:$0xff] %vm385_vm9, %v762_v30 }
 0x1a9   : > { %v510_v41 = vpop.f32.mrf.mxu0 }
 0x1aa   : > { %581 = vst.msk [vmem:[%s1158_s7 + $0x10] sm:$0xff] %vm385_vm9, %v510_v41 }
 0x1af   : > { %v765_v46 = vpop.f32.mrf.mxu0 }
 0x1b0   : > { %584 = vst.msk [vmem:[%s1158_s7 + $0x28] sm:$0xff] %vm385_vm9, %v765_v46 }
 0x1b1   : > { %v520_v36 = vpop.f32.mrf.mxu0 }
 0x1b2   : > { %583 = vst.msk [vmem:[%s1158_s7 + $0x20] sm:$0xff] %vm385_vm9, %v520_v36 }
 0x1b7   : > { %v768_v47 = vpop.f32.mrf.mxu0 }
 0x1b8   : > { %586 = vst.msk [vmem:[%s1158_s7 + $0x38] sm:$0xff] %vm385_vm9, %v768_v47 }
 0x1b9   : > { %v530_v48 = vpop.f32.mrf.mxu0 }
 0x1ba   : > { %585 = vst.msk [vmem:[%s1158_s7 + $0x30] sm:$0xff] %vm385_vm9, %v530_v48 }
 0x1bf   : > { %v771_v42 = vpop.f32.mrf.mxu1 }
 0x1c0   : > { %588 = vst.msk [vmem:[%s1158_s7 + $0x48] sm:$0xff] %vm385_vm9, %v771_v42 }
 0x1c1   : > { %v540_v26 = vpop.f32.mrf.mxu1 }
 0x1c2   : > { %587 = vst.msk [vmem:[%s1158_s7 + $0x40] sm:$0xff] %vm385_vm9, %v540_v26 }
 0x1c7   : > { %v774_v43 = vpop.f32.mrf.mxu1 }
 0x1c8   : > { %590 = vst.msk [vmem:[%s1158_s7 + $0x58] sm:$0xff] %vm385_vm9, %v774_v43 }
 0x1c9   : > { %v550_v49 = vpop.f32.mrf.mxu1 }
 0x1ca   : > { %589 = vst.msk [vmem:[%s1158_s7 + $0x50] sm:$0xff] %vm385_vm9, %v550_v49 }
 0x1cf   : > { %v777_v50 = vpop.f32.mrf.mxu1 }
 0x1d0   : > { %592 = vst.msk [vmem:[%s1158_s7 + $0x68] sm:$0xff] %vm385_vm9, %v777_v50 }
 0x1d1   : > { %v560_v51 = vpop.f32.mrf.mxu1 }
 0x1d2   : > { %591 = vst.msk [vmem:[%s1158_s7 + $0x60] sm:$0xff] %vm385_vm9, %v560_v51 }
 0x1d7   : > { %v780_v52 = vpop.f32.mrf.mxu1 }
 0x1d8   : > { %594 = vst.msk [vmem:[%s1158_s7 + $0x78] sm:$0xff] %vm385_vm9, %v780_v52 }
 0x1d9   : > { %v570_v53 = vpop.f32.mrf.mxu1 }
 0x1da   : > { %593 = vst.msk [vmem:[%s1158_s7 + $0x70] sm:$0xff] %vm385_vm9, %v570_v53 }
 0x1db PF: > { %p13_p5 = scmp.ge.s32.totalorder %s1009_s20, 4   ;;  %s1220_s9 = smov %s932_s10 }
 0x1dc   : > { %s1221_s10 = smov %s936_s11  ;;  %s1222_s11 = smov %s1026_s28 }
 0x1dd   : > { %s1223_s12 = smov %s1009_s20  ;;  %15 = sbr.rel (!%p13_p5) target bundleno = 4 (0x4), region = 72 }
 0x1e2   :  { %617 = vsyncpa [#allocation4], 1 }
 0x1e3   :  { %619 = vsyncpa [#allocation4 + $0x1], 1 }
 0x1e4   :  { %620 = vsyncpa [#allocation6], 1 }

</bundles_post_ra>
